<compile_context>
chip_gen: v7x
topology: tpu7x:2x2x1
jax: 0.10.0
libtpu: 0.0.40
codegen_flags: <defaults>
</compile_context>

<pallas_src>
import math
import jax
import jax.numpy as jnp
from jax.experimental import pallas as pl
from jax.experimental.pallas import tpu as pltpu


def _linear_mask_kernel(x_ref, w_ref, b_ref, o_ref):
    """One M-tile: y = x @ W + b, then zero y where x[:, :N] == 0."""
    x = x_ref[...]                                            # (tm, K) native dtype
    y = jnp.dot(x, w_ref[...], preferred_element_type=jnp.float32)   # (tm, N) f32
    y = y + b_ref[...].astype(jnp.float32)                    # (1, N) broadcast
    n = o_ref.shape[-1]
    mask = x[:, :n] == 0                                      # (tm, N), VPU filler
    o_ref[...] = jnp.where(mask, 0.0, y).astype(o_ref.dtype)


def input_processing(x, w_kn, b_n, output_dim, *, tm=1024):
    """JAX wrapper reproducing inputProcessing.forward / reduceDim.

    x:      (..., K) array (any float dtype; f32 or bf16 typical)
    w_kn:   (K, output_dim) weight (= PyTorch Linear weight transposed)
    b_n:    (output_dim,)   bias
    """
    orig_shape = x.shape
    k = orig_shape[-1]
    assert k >= output_dim, "mask slice requires input_dim >= output_dim"
    m = math.prod(orig_shape[:-1])
    x2 = x.reshape(m, k)                       # native dtype, no f32 copy

    # Tile: multiple of 8 sublanes, clamped so tiny inputs don't over-pad.
    tm_eff = min(tm, ((m + 7) // 8) * 8)
    tm_eff = max(8, ((tm_eff + 7) // 8) * 8)
    m_pad = pl.cdiv(m, tm_eff) * tm_eff
    if m_pad != m:
        # Padded rows are all-zero -> fully masked to 0 -> sliced off below.
        x2 = jnp.pad(x2, ((0, m_pad - m), (0, 0)))

    grid = (m_pad // tm_eff,)

    out = pl.pallas_call(
        _linear_mask_kernel,
        out_shape=jax.ShapeDtypeStruct((m_pad, output_dim), jnp.float32),
        grid_spec=pltpu.PrefetchScalarGridSpec(
            num_scalar_prefetch=0,
            grid=grid,
            in_specs=[
                pl.BlockSpec((tm_eff, k), lambda i: (i, 0)),          # x tile
                pl.BlockSpec((k, output_dim), lambda i: (0, 0)),      # W (resident)
                pl.BlockSpec((1, output_dim), lambda i: (0, 0)),      # bias (resident)
            ],
            out_specs=pl.BlockSpec((tm_eff, output_dim), lambda i: (i, 0)),
        ),
        compiler_params=pltpu.CompilerParams(
            dimension_semantics=("parallel",)),   # shards M-tiles across TCs (v7x)
    )(x2, w_kn, b_n.reshape(1, output_dim))

    if m_pad != m:
        out = out[:m]
    return out.reshape(orig_shape[:-1] + (output_dim,))


def _reference(x, w_kn, b_n, output_dim):
    """Plain-JAX reference with the exact PyTorch semantics (incl. bias gate)."""
    k = x.shape[-1]
    x2 = x.reshape(-1, k).astype(jnp.float32)
    has_nz = jnp.any(x2 != 0).astype(jnp.float32)
    y = x2 @ w_kn.astype(jnp.float32) + has_nz * b_n.astype(jnp.float32)
    y = jnp.where(x2[:, :output_dim] == 0, 0.0, y)
    return y.reshape(x.shape[:-1] + (output_dim,))


if __name__ == "__main__":
    key = jax.random.PRNGKey(0)
    k_x, k_z, k_w, k_b, k_x2 = jax.random.split(key, 5)

    # Shapes consistent with the module: 4-D feature-last input, K = hidden_dim.
    B, C, H, K = 2, 4, 8, 64
    OUTPUT_DIM = 64                      # module default: output_dim = hidden_dim

    # Deterministic Linear(K, OUTPUT_DIM) parameters (PyTorch-style init range).
    bound = 1.0 / math.sqrt(K)
    w_pt = jax.random.uniform(k_w, (OUTPUT_DIM, K), minval=-bound, maxval=bound)
    b_pt = jax.random.uniform(k_b, (OUTPUT_DIM,), minval=-bound, maxval=bound)
    w_kn = w_pt.T                        # (K, N) for x @ W

    ok = True

    # --- Test 1: 4-D input with sprinkled zeros (exercises the mask path).
    x = jax.random.normal(k_x, (B, C, H, K), dtype=jnp.float32)
    keep = jax.random.bernoulli(k_z, p=0.7, shape=(B, C, H, K))
    x = x * keep.astype(jnp.float32)
    y = jax.block_until_ready(input_processing(x, w_kn, b_pt, OUTPUT_DIM))
    ok &= bool(jnp.allclose(y, _reference(x, w_kn, b_pt, OUTPUT_DIM),
                            atol=1e-5, rtol=1e-5))
    ok &= y.shape == (B, C, H, OUTPUT_DIM)

    # --- Test 2: 2-D input with M not a multiple of the tile (padding path).
    x2d = jax.random.normal(k_x2, (10, K), dtype=jnp.float32)
    x2d = x2d.at[:, ::5].set(0.0)
    y2d = jax.block_until_ready(input_processing(x2d, w_kn, b_pt, OUTPUT_DIM))
    ok &= bool(jnp.allclose(y2d, _reference(x2d, w_kn, b_pt, OUTPUT_DIM),
                            atol=1e-5, rtol=1e-5))

    # --- Test 3: all-zero input (bias-gate redundancy check: output must be 0).
    xz = jnp.zeros((B, C, H, K), dtype=jnp.float32)
    yz = jax.block_until_ready(input_processing(xz, w_kn, b_pt, OUTPUT_DIM))
    ok &= bool(jnp.allclose(yz, 0.0))
    ok &= bool(jnp.allclose(yz, _reference(xz, w_kn, b_pt, OUTPUT_DIM)))

    assert ok
    print("KERNEL_OK")
</pallas_src>

<mosaic_0001>
module attributes {stable_mosaic.version = 11 : i64} {
  func.func @_linear_mask_kernel(%arg0: i32, %arg1: memref<64x64xf32, #tpu.memory_space<vmem>>, %arg2: memref<64x64xf32, #tpu.memory_space<vmem>>, %arg3: memref<1x64xf32, #tpu.memory_space<vmem>>, %arg4: memref<64x64xf32, #tpu.memory_space<vmem>>) attributes {dimension_semantics = [#tpu.dimension_semantics<parallel>], iteration_bounds = array<i64: 1>, scalar_prefetch = 0 : i64, scratch_operands = 0 : i64, tpu.core_type = #tpu.core_type<tc>, window_params = [{transform_indices = @transform_0, window_bounds = array<i64: 64, 64>}, {pipeline_mode = #tpu.pipeline_mode<synchronous>, transform_indices = @transform_1, window_bounds = array<i64: 64, 64>}, {pipeline_mode = #tpu.pipeline_mode<synchronous>, transform_indices = @transform_2, window_bounds = array<i64: 1, 64>}, {transform_indices = @transform_3, window_bounds = array<i64: 64, 64>}]} {
    %c0 = arith.constant 0 : index
    %c0_0 = arith.constant 0 : index
    %0 = vector.load %arg1[%c0, %c0_0] : memref<64x64xf32, #tpu.memory_space<vmem>>, vector<64x64xf32>
    %c0_1 = arith.constant 0 : index
    %c0_2 = arith.constant 0 : index
    %1 = vector.load %arg2[%c0_1, %c0_2] : memref<64x64xf32, #tpu.memory_space<vmem>>, vector<64x64xf32>
    %cst = arith.constant dense<0.000000e+00> : vector<64x64xf32>
    %2 = tpu.matmul %0, %1, %cst {dimension_numbers = #tpu.dot_dimension_numbers<[1], [0], [0], [1], [0, 0, 1, 1], [], []>} : vector<64x64xf32>, vector<64x64xf32>, vector<64x64xf32> -> vector<64x64xf32>
    %c0_3 = arith.constant 0 : index
    %c0_4 = arith.constant 0 : index
    %3 = vector.load %arg3[%c0_3, %c0_4] : memref<1x64xf32, #tpu.memory_space<vmem>>, vector<1x64xf32>
    %4 = vector.broadcast %3 : vector<1x64xf32> to vector<64x64xf32>
    %5 = arith.addf %2, %4 : vector<64x64xf32>
    %cst_5 = arith.constant 0.000000e+00 : f32
    %6 = vector.broadcast %cst_5 : f32 to vector<64x64xf32>
    %7 = arith.cmpf oeq, %0, %6 : vector<64x64xf32>
    %cst_6 = arith.constant 0.000000e+00 : f32
    %8 = vector.broadcast %cst_6 : f32 to vector<64x64xf32>
    %9 = arith.select %7, %8, %5 : vector<64x64xi1>, vector<64x64xf32>
    %c0_7 = arith.constant 0 : index
    %c0_8 = arith.constant 0 : index
    %10 = vector.load %arg4[%c0_7, %c0_8] : memref<64x64xf32, #tpu.memory_space<vmem>>, vector<64x64xf32>
    tpu.vector_store %arg4[%c0_7, %c0_8], %9 {strides = array<i32>} : memref<64x64xf32, #tpu.memory_space<vmem>>, vector<64x64xf32>,
    return
  }
  func.func @transform_0(%arg0: i32) -> (i32, i32) {
    %c0_i32 = arith.constant 0 : i32
    %c0_i32_0 = arith.constant 0 : i32
    return %arg0, %c0_i32 : i32, i32
  }
  func.func @transform_1(%arg0: i32) -> (i32, i32) {
    %c0_i32 = arith.constant 0 : i32
    %c0_i32_0 = arith.constant 0 : i32
    %c0_i32_1 = arith.constant 0 : i32
    return %c0_i32, %c0_i32_0 : i32, i32
  }
  func.func @transform_2(%arg0: i32) -> (i32, i32) {
    %c0_i32 = arith.constant 0 : i32
    %c0_i32_0 = arith.constant 0 : i32
    %c0_i32_1 = arith.constant 0 : i32
    return %c0_i32, %c0_i32_0 : i32, i32
  }
  func.func @transform_3(%arg0: i32) -> (i32, i32) {
    %c0_i32 = arith.constant 0 : i32
    %c0_i32_0 = arith.constant 0 : i32
    return %arg0, %c0_i32 : i32, i32
  }
}

</mosaic_0001>

<bundles_post_ra>
// kernel: tpu_custom_call.1
= control target key start
LH: loop header
LB: loop body
LE: loop exit
PB: predicated region body
PF: predicated region fallthrough
CT: control target
= control target key end

     0   :  { %8 = vsyncpa [#allocation3], 0  ;;  %s482_s0 = inlined_call_operand.hbm [shape: f32[64,64], index: 0, kind: input, shape index: {}]   ;;  %s483_s1 = inlined_call_operand.hbm [shape: f32[64,64], index: 1, kind: input, shape index: {}]   ;;  %s484_s2 = inlined_call_operand.vmem [shape: f32[1,64], index: 2, kind: input, shape index: {}]   ;;  %s485_s3 = inlined_call_operand.hbm [shape: f32[64,64], index: 3, kind: output, shape index: {}]  }
   0x1   :  { %9 = vsyncpa [#allocation6], 0 }
   0x2   :  { %10 = vsyncpa [#allocation4], 0  ;;  %s392_s12 = smov [#allocation2]   ;;  %s320_s16 = scalar_lea.hbm %s482_s0, 1024 }
   0x3   :  { %s16_s13 = sshll.u32 %s392_s12, 4  ;;  %p321_p0 = scmp.ne.s32.totalorder %s482_s0, %s320_s16  ;;  %s17_s13 = int_to_ptr.vmem [resolvable:$true] %s16_s13 }
   0x4   :  { %p324_p1 = scmp.lt.u32.totalorder %s320_s16, %s482_s0 }
   0x6   :  { %p326_p2 = pnand %p324_p1, %p321_p0 }
   0x8   :  { %329 = shalt.err (!%p326_p2)
}
   0x9   :  { %s330_s21 = scalar_lea.vmem %s17_s13, 1024  ;;  %p335_p4 = scmp.lt.s32.totalorder %s17_s13, %s17_s13 }
   0xa   :  { %p331_p3 = scmp.ne.s32.totalorder %s17_s13, %s330_s21  ;;  %p336_p5 = scmp.lt.s32.totalorder %s330_s21, %s330_s21 }
   0xc   :  { %p337_p6 = por %p336_p5, %p335_p4 }
   0xe   :  { %p338_p7 = pnand %p337_p6, %p331_p3 }
  0x10   :  { %341 = shalt.err (!%p338_p7)
}
  0x11   :  { %s393_s22 = smov 128   ;;  %s394_s23 = smov 8  }
  0x12   :  { %22 = dma.hbm_to_vmem [thread:$0]  %s482_s0, 1024, %s17_s13, [#allocation3], %s393_s22, %s393_s22, %s394_s23  }
  0x13   :  { %s395_s26 = smov [#allocation5]   ;;  %s342_s30 = scalar_lea.hbm %s483_s1, 1024 }
  0x14   :  { %s28_s27 = sshll.u32 %s395_s26, 4  ;;  %p343_p8 = scmp.ne.s32.totalorder %s483_s1, %s342_s30  ;;  %s29_s27 = int_to_ptr.vmem [resolvable:$true] %s28_s27 }
  0x15   :  { %p346_p9 = scmp.lt.u32.totalorder %s342_s30, %s483_s1 }
  0x17   :  { %p348_p10 = pnand %p346_p9, %p343_p8 }
  0x19   :  { %351 = shalt.err (!%p348_p10)
}
  0x1a   :  { %s352_s8 = scalar_lea.vmem %s29_s27, 1024  ;;  %p357_p12 = scmp.lt.s32.totalorder %s29_s27, %s29_s27 }
  0x1b   :  { %p353_p11 = scmp.ne.s32.totalorder %s29_s27, %s352_s8  ;;  %p358_p13 = scmp.lt.s32.totalorder %s352_s8, %s352_s8 }
  0x1d   :  { %p359_p0 = por %p358_p13, %p357_p12 }
  0x1f   :  { %p360_p1 = pnand %p359_p0, %p353_p11 }
  0x21   :  { %363 = shalt.err (!%p360_p1)
}
  0x22   :  { %34 = dma.hbm_to_vmem [thread:$0]  %s483_s1, 1024, %s29_s27, [#allocation6], %s393_s22, %s393_s22, %s394_s23  }
  0x23   :  { %386 = dma.done.wait [#allocation3], 1024  }
  0x24   :  { %387 = vsyncadd [#allocation3], 4294966272 }
  0x25   :  { %388 = dma.done.wait [#allocation6], 1024  }
  0x26   :  { %389 = vsyncadd [#allocation6], 4294966272  ;;  %v51_v0 = vld [vmem:[#allocation5] sm:$0xff]  ;;  %v52_v1 = vld [vmem:[#allocation5 + $0x8] sm:$0xff]  ;;  %vm66_vm0 = vcmask 523264  }
  0x27   :  { %v53_v2 = vld [vmem:[#allocation5 + $0x10] sm:$0xff]  ;;  %v291_v3 = vpack.c.bf16 %v52_v1, %v51_v0  ;;  %v54_v4 = vld [vmem:[#allocation5 + $0x18] sm:$0xff]  ;;  %v55_v6 = vld [vmem:[#allocation5 + $0x20] sm:$0xff] }
  0x28   :  { %v295_v5 = vpack.c.bf16 %v54_v4, %v53_v2  ;;  %v56_v7 = vld [vmem:[#allocation5 + $0x28] sm:$0xff]  ;;  %v43_v8 = vld [vmem:[#allocation2] sm:$0xff]  ;;  %v57_v11 = vld [vmem:[#allocation5 + $0x30] sm:$0xff] }
  0x29   :  { %292 = vmatprep.subr.bf16.mxu0 %v291_v3  ;;  %307 = vmatprep.subr.bf16.mxu1 %v291_v3  ;;  %v47_v9 = vld [vmem:[#allocation2 + $0x20] sm:$0xff]  ;;  %v299_v10 = vpack.c.bf16 %v56_v7, %v55_v6  ;;  %v58_v12 = vld [vmem:[#allocation5 + $0x38] sm:$0xff]  ;;  %v44_v14 = vld [vmem:[#allocation2 + $0x8] sm:$0xff]  ;;  %vm196_vm3 = vcmp.eq.f32.partialorder %v43_v8, 0.0 }
  0x2a   :  { %294 = vmatpush3.bf16.msra.mxu0 %v291_v3  ;;  %311 = vmatpush3.bf16.msra.mxu1 %v291_v3  ;;  %v303_v13 = vpack.c.bf16 %v58_v12, %v57_v11  ;;  %v48_v15 = vld [vmem:[#allocation2 + $0x28] sm:$0xff]  ;;  %v45_v16 = vld [vmem:[#allocation2 + $0x10] sm:$0xff]  ;;  %v46_v18 = vld [vmem:[#allocation2 + $0x18] sm:$0xff]  ;;  %vm197_vm1 = vcmp.eq.f32.partialorder %v44_v14, 0.0  ;;  %vm200_vm4 = vcmp.eq.f32.partialorder %v47_v9, 0.0 }
  0x2b   :  { %296 = vmatprep.subr.bf16.mxu0 %v295_v5  ;;  %308 = vmatprep.subr.bf16.mxu1 %v295_v5  ;;  %v49_v17 = vld [vmem:[#allocation2 + $0x30] sm:$0xff]  ;;  %v50_v19 = vld [vmem:[#allocation2 + $0x38] sm:$0xff]  ;;  %v238_v20 = vld [vmem:[%s484_s2] ss:$0 sm:$0xff]  ;;  %vm201_vm2 = vcmp.eq.f32.partialorder %v48_v15, 0.0  ;;  %vm199_vm5 = vcmp.eq.f32.partialorder %v46_v18, 0.0 }
  0x2c   :  { %279 = vmatprep.mubr.msk.f32.mxu0 %vm66_vm0, %v43_v8  ;;  %285 = vmatprep.mubr.msk.f32.mxu1 %vm66_vm0, %v47_v9  ;;  %vm203_vm6 = vcmp.eq.f32.partialorder %v50_v19, 0.0  ;;  %s396_s2 = smov [#allocation7]   ;;  %vm198_vm7 = vcmp.eq.f32.partialorder %v45_v16, 0.0  ;;  %vm202_vm8 = vcmp.eq.f32.partialorder %v49_v17, 0.0 }
  0x2d   :  { %s225_s11 = sshll.u32 %s396_s2, 4  ;;  %s226_s11 = int_to_ptr.vmem [resolvable:$true] %s225_s11 }
  0x2e   :  { %298 = vmatpush3.bf16.msra.mxu0 %v295_v5  ;;  %312 = vmatpush3.bf16.msra.mxu1 %v295_v5  ;;  %s364_s12 = scalar_lea.vmem %s226_s11, 1024  ;;  %p369_p3 = scmp.lt.s32.totalorder %s226_s11, %s226_s11 }
  0x2f   :  { %300 = vmatprep.subr.bf16.mxu0 %v299_v10  ;;  %309 = vmatprep.subr.bf16.mxu1 %v299_v10  ;;  %p365_p2 = scmp.ne.s32.totalorder %s226_s11, %s364_s12  ;;  %p370_p4 = scmp.lt.s32.totalorder %s364_s12, %s364_s12 }
  0x31   :  { %p371_p5 = por %p370_p4, %p369_p3 }
  0x32   :  { %302 = vmatpush3.bf16.msra.mxu0 %v299_v10  ;;  %313 = vmatpush3.bf16.msra.mxu1 %v299_v10 }
  0x33   :  { %304 = vmatprep.subr.bf16.mxu0 %v303_v13  ;;  %310 = vmatprep.subr.bf16.mxu1 %v303_v13  ;;  %p372_p6 = pnand %p371_p5, %p365_p2 }
  0x36   :  { %306 = vmatpush3.bf16.msra.mxu0 %v303_v13  ;;  %314 = vmatpush3.bf16.msra.mxu1 %v303_v13 }
  0x39   :  { %280 = vmatmul.mubr.msk.f32.vlgmr.msra.gmra.mrb[0].mxu0 %vm66_vm0, %v44_v14  ;;  %286 = vmatmul.mubr.msk.f32.vlgmr.msra.gmra.mrb[0].mxu1 %vm66_vm0, %v48_v15 }
  0x3a   :  { %282 = vmatprep.mubr.msk.f32.mxu0 %vm66_vm0, %v45_v16  ;;  %288 = vmatprep.mubr.msk.f32.mxu1 %vm66_vm0, %v49_v17 }
  0x3d   :  { %283 = vmatmul.mubr.msk.f32.gmra.mrb[2].mxu0 %vm66_vm0, %v46_v18  ;;  %289 = vmatmul.mubr.msk.f32.gmra.mrb[2].mxu1 %vm66_vm0, %v50_v19 }
 0x10c   :  { %v281_v21 = vpop.f32.mrb[0].mxu0  ;;  %v287_v22 = vpop.f32.mrb[0].mxu1 }
 0x10d   :  { %v163_v23 = vadd.f32 %v281_v21, %v238_v20  ;;  %v183_v24 = vadd.f32 %v287_v22, %v238_v20  ;;  %v157_v25 = vpop.f32.mrb[1].mxu0  ;;  %v177_v26 = vpop.f32.mrb[1].mxu1 }
 0x10e   :  { %v158_v27 = vadd.f32 %v238_v20, %v157_v25  ;;  %v178_v28 = vadd.f32 %v238_v20, %v177_v26 }
 0x10f   :  { %v205_v29 = vsel %vm197_vm1, 0.0, %v163_v23  ;;  %v209_v30 = vsel %vm201_vm2, 0.0, %v183_v24 }
 0x110   :  { %213 = vst.msk [vmem:[#allocation7 + $0x8] sm:$0xff] %vm66_vm0, %v205_v29  ;;  %217 = vst.msk [vmem:[#allocation7 + $0x28] sm:$0xff] %vm66_vm0, %v209_v30  ;;  %v204_v31 = vsel %vm196_vm3, 0.0, %v158_v27  ;;  %v208_v32 = vsel %vm200_vm4, 0.0, %v178_v28  ;;  %v284_v33 = vpop.f32.mrb[2].mxu0  ;;  %v290_v34 = vpop.f32.mrb[2].mxu1 }
 0x111   :  { %212 = vst.msk [vmem:[#allocation7] sm:$0xff] %vm66_vm0, %v204_v31  ;;  %216 = vst.msk [vmem:[#allocation7 + $0x20] sm:$0xff] %vm66_vm0, %v208_v32  ;;  %v173_v35 = vadd.f32 %v284_v33, %v238_v20  ;;  %v193_v36 = vadd.f32 %v290_v34, %v238_v20  ;;  %v167_v37 = vpop.f32.mrb[3].mxu0  ;;  %v187_v38 = vpop.f32.mrb[3].mxu1 }
 0x112   :  { %v168_v39 = vadd.f32 %v238_v20, %v167_v37  ;;  %v188_v40 = vadd.f32 %v238_v20, %v187_v38 }
 0x113   :  { %v207_v41 = vsel %vm199_vm5, 0.0, %v173_v35  ;;  %v211_v42 = vsel %vm203_vm6, 0.0, %v193_v36 }
 0x114   :  { %215 = vst.msk [vmem:[#allocation7 + $0x18] sm:$0xff] %vm66_vm0, %v207_v41  ;;  %219 = vst.msk [vmem:[#allocation7 + $0x38] sm:$0xff] %vm66_vm0, %v211_v42  ;;  %v206_v43 = vsel %vm198_vm7, 0.0, %v168_v39  ;;  %v210_v44 = vsel %vm202_vm8, 0.0, %v188_v40 }
 0x115   :  { %214 = vst.msk [vmem:[#allocation7 + $0x10] sm:$0xff] %vm66_vm0, %v206_v43  ;;  %218 = vst.msk [vmem:[#allocation7 + $0x30] sm:$0xff] %vm66_vm0, %v210_v44 }
 0x116   :  { %375 = shalt.err (!%p372_p6)
}
 0x117   :  { %s376_s15 = scalar_lea.hbm %s485_s3, 1024 }
 0x118   :  { %p377_p7 = scmp.ne.s32.totalorder %s485_s3, %s376_s15  ;;  %p380_p8 = scmp.lt.u32.totalorder %s376_s15, %s485_s3 }
 0x11a   :  { %p382_p9 = pnand %p380_p8, %p377_p7 }
 0x11c   :  { %385 = shalt.err (!%p382_p9)
}
 0x11d   :  { %231 = dma.vmem_to_hbm [thread:$0]  %s226_s11, 1024, %s485_s3, [#allocation4], %s393_s22, %s393_s22, %s394_s23  }
 0x11e   :  { %390 = dma.done.wait [#allocation4], 1024  }
 0x11f   :  { %391 = vsyncadd [#allocation4], 4294966272 }
 0x120   :  { %235 = vsyncpa [#allocation3], 1 }
 0x121   :  { %236 = vsyncpa [#allocation6], 1 }
 0x122   :  { %237 = vsyncpa [#allocation4], 1 }

</bundles_post_ra>
